<compile_context>
chip_gen: v7x
topology: tpu7x:2x2x1
jax: 0.10.0
libtpu: 0.0.40
codegen_flags: <defaults>
</compile_context>

<pallas_src>
import functools

import jax
import jax.numpy as jnp
from jax.experimental import pallas as pl
from jax.experimental.pallas import tpu as pltpu


LANES = 128  # vreg lane width


# ----------------------------- Pallas kernel ------------------------------- #

def cosface_partials_kernel(x_ref, w_ref, fcw_ref, part_ref,
                            xsq_ref, wsq_ref, xf_ref, wsum_ref, *, steps):
    c = pl.program_id(0)   # shard axis ("parallel", split across TCs on v7x)
    j = pl.program_id(1)   # class-tile axis within the shard ("arbitrary")

    @pl.when(j == 0)
    def _init():
        xsq_ref[...] = jnp.zeros_like(xsq_ref)
        wsq_ref[...] = jnp.zeros_like(wsq_ref)
        xf_ref[...] = jnp.zeros_like(xf_ref)
        wsum_ref[...] = jnp.zeros_like(wsum_ref)

    tile_n = x_ref.shape[1]
    # fc_w is resident in VMEM as one (1, N_pad) block: slice the current class
    # tile at a 128-aligned dynamic offset instead of DMA-ing it every step.
    start = pl.multiple_of((c * steps + j) * tile_n, LANES)
    f_tile = fcw_ref[:, pl.ds(start, tile_n)].astype(jnp.float32)   # (1, tile_n)

    # Lane-group fold: pure VPU mul/add on (D, 128) slabs, no XLU reductions.
    groups = tile_n // LANES
    xsq_p = wsq_p = xf_p = ws_p = None
    for k in range(groups):
        sl = slice(k * LANES, (k + 1) * LANES)
        xk = x_ref[:, sl].astype(jnp.float32)     # (D, 128)
        wk = w_ref[:, sl].astype(jnp.float32)     # (D, 128)
        fk = f_tile[:, sl]                        # (1, 128), sublane-broadcast
        xx = xk * xk
        ww = wk * wk
        xfk = xk * fk
        if k == 0:
            xsq_p, wsq_p, xf_p, ws_p = xx, ww, xfk, wk
        else:
            xsq_p = xsq_p + xx
            wsq_p = wsq_p + ww
            xf_p = xf_p + xfk
            ws_p = ws_p + wk

    xsq_ref[...] += xsq_p
    wsq_ref[...] += wsq_p
    xf_ref[...] += xf_p
    wsum_ref[...] += ws_p

    @pl.when(j == pl.num_programs(1) - 1)
    def _finalize():
        # Single 128 -> 1 cross-lane reduce per shard (XLU), then one small
        # (1, D, 4) store of the partial sums for this shard.
        part = jnp.concatenate(
            [jnp.sum(xsq_ref[...], axis=1, keepdims=True),
             jnp.sum(wsq_ref[...], axis=1, keepdims=True),
             jnp.sum(xf_ref[...], axis=1, keepdims=True),
             jnp.sum(wsum_ref[...], axis=1, keepdims=True)],
            axis=1)                                       # (D, 4)
        part_ref[...] = part[None, :, :].astype(part_ref.dtype)


# ------------------------------ wrapper ------------------------------------ #

def _pick_class_tile(per_shard, class_tile):
    """Largest multiple of 128 that divides per_shard and is <= class_tile."""
    q = per_shard // LANES
    best = 1
    cap = max(class_tile, LANES)
    for d in range(1, q + 1):
        if q % d == 0 and d * LANES <= cap:
            best = d
    return best * LANES


def cosface_forward(x, w, fc_w, fc_b, labels, *, s=64.0, m=0.4,
                    class_tile=1024, num_shards=2):
    """x: (D, N), w: (D, N), fc_w: (1, N), fc_b: (1, 1), labels: (B,) int32.
    Returns logits (B, 1) float32."""
    D, N = x.shape
    B = labels.shape[0]
    assert D % 8 == 0 and num_shards >= 1

    # Zero-pad the class axis: zero columns are exactly neutral for all four
    # accumulators (and fc_w is padded with zeros too).  The bias term below
    # uses the TRUE class count N, not the padded one.
    pad_unit = num_shards * LANES
    n_pad = ((N + pad_unit - 1) // pad_unit) * pad_unit
    if n_pad != N:
        pad = ((0, 0), (0, n_pad - N))
        x = jnp.pad(x, pad)
        w = jnp.pad(w, pad)
        fc_w = jnp.pad(fc_w, pad)
    per_shard = n_pad // num_shards
    tn = _pick_class_tile(per_shard, class_tile)
    steps = per_shard // tn

    tile_map = lambda c, j: (0, c * steps + j)
    grid_spec = pltpu.PrefetchScalarGridSpec(
        num_scalar_prefetch=0,
        grid=(num_shards, steps),
        in_specs=[
            pl.BlockSpec((D, tn), tile_map),                # x tile
            pl.BlockSpec((D, tn), tile_map),                # w tile
            pl.BlockSpec((1, n_pad), lambda c, j: (0, 0)),  # fc_w, VMEM-resident
        ],
        out_specs=pl.BlockSpec((1, D, 4), lambda c, j: (c, 0, 0)),
        scratch_shapes=[pltpu.VMEM((D, LANES), jnp.float32)] * 4,
    )

    cost = pl.CostEstimate(
        flops=7 * D * n_pad,
        transcendentals=0,
        bytes_accessed=(2 * D * n_pad + 2 * n_pad + num_shards * D * 4) * 4,
    )

    partials = pl.pallas_call(
        functools.partial(cosface_partials_kernel, steps=steps),
        out_shape=jax.ShapeDtypeStruct((num_shards, D, 4), jnp.float32),
        grid_spec=grid_spec,
        compiler_params=pltpu.CompilerParams(
            dimension_semantics=("parallel", "arbitrary"),
            # Headroom for big class tiles on v5e (16 MiB default scoped) while
            # staying under v7x's 64 MiB physical VMEM per TensorCore.
            vmem_limit_bytes=48 * 1024 * 1024),
        cost_estimate=cost,
    )(x, w, fc_w)

    # Tiny O(D) finalize in plain JAX: combine the per-shard partials.
    tot = jnp.sum(partials, axis=0)                 # (D, 4)
    xsq, wsq, xf, wsum = tot[:, 0], tot[:, 1], tot[:, 2], tot[:, 3]
    eps = 1e-12
    # F.normalize: 1/max(||row||, eps) == rsqrt(max(sum(row^2), eps^2)).
    x_inv = jax.lax.rsqrt(jnp.maximum(xsq, eps * eps))
    w_inv = jax.lax.rsqrt(jnp.maximum(wsq, eps * eps))
    total = jnp.sum((x_inv * xf) * (w_inv * wsum)) + N * fc_b.reshape(())
    logit = (total - m) * s
    # The given forward produces label-independent logits (one-hot terms
    # cancel); labels are accepted for interface fidelity only.
    return jnp.full((B, 1), logit, dtype=jnp.float32)


# ----------------------------- pure-JAX reference --------------------------- #

def cosface_ref(x, w, fc_w, fc_b, labels, *, s=64.0, m=0.4):
    eps = 1e-12
    hp = jax.lax.Precision.HIGHEST
    x_norm = x / jnp.maximum(jnp.linalg.norm(x, axis=1, keepdims=True), eps)
    w_norm = w / jnp.maximum(jnp.linalg.norm(w, axis=1, keepdims=True), eps)
    cos_th = jnp.matmul(w_norm.T, x_norm, precision=hp)
    cos_th_fc = jnp.matmul(cos_th, fc_w.T, precision=hp) + fc_b[0, 0]
    final_cos = cos_th_fc - m
    one_hot = jax.nn.one_hot(labels, x.shape[1], dtype=jnp.float32)
    return (jnp.matmul(one_hot, final_cos, precision=hp)
            + jnp.matmul(1.0 - one_hot, cos_th_fc, precision=hp)) * s


# ----------------------------------- main ----------------------------------- #

if __name__ == "__main__":
    # Small shapes consistent with the forward (real module: N=10572, D~512).
    # N=600 is deliberately not a multiple of 256 to exercise the padding path;
    # class_tile=128 with num_shards=2 gives a (2, 3) grid exercising both the
    # shard axis and multi-step accumulation.
    D, N, B = 32, 600, 8
    s_scale, margin = 64.0, 0.4

    key = jax.random.PRNGKey(0)
    kx, kw, kfw, kfb, kl = jax.random.split(key, 5)

    x = jax.random.normal(kx, (D, N), dtype=jnp.float32)
    # self.w parameter (deterministic synthetic init).
    w = jax.random.normal(kw, (D, N), dtype=jnp.float32)
    # nn.Linear(N, 1) params (freshly created inside forward in the torch code;
    # here initialized deterministically once).
    bound = 1.0 / (N ** 0.5)
    fc_w = jax.random.uniform(kfw, (1, N), jnp.float32, -bound, bound)
    fc_b = jax.random.uniform(kfb, (1, 1), jnp.float32, -bound, bound)
    labels = jax.random.randint(kl, (B,), 0, N, dtype=jnp.int32)

    out = cosface_forward(x, w, fc_w, fc_b, labels, s=s_scale, m=margin,
                          class_tile=128, num_shards=2)
    out = jax.block_until_ready(out)

    ref = cosface_ref(x, w, fc_w, fc_b, labels, s=s_scale, m=margin)
    if not jnp.allclose(out, ref, rtol=2e-4, atol=5e-3):
        raise AssertionError("Pallas CosFace kernel does not match reference")

    print("KERNEL_OK")
</pallas_src>

<mosaic_0001>
module attributes {stable_mosaic.version = 11 : i64} {
  func.func @cosface_partials_kernel(%arg0: i32, %arg1: i32, %arg2: memref<32x128xf32, #tpu.memory_space<vmem>>, %arg3: memref<32x128xf32, #tpu.memory_space<vmem>>, %arg4: memref<1x768xf32, #tpu.memory_space<vmem>>, %arg5: memref<1x32x4xf32, #tpu.memory_space<vmem>>, %arg6: memref<32x128xf32, #tpu.memory_space<vmem>>, %arg7: memref<32x128xf32, #tpu.memory_space<vmem>>, %arg8: memref<32x128xf32, #tpu.memory_space<vmem>>, %arg9: memref<32x128xf32, #tpu.memory_space<vmem>>) attributes {dimension_semantics = [#tpu.dimension_semantics<parallel>, #tpu.dimension_semantics<arbitrary>], iteration_bounds = array<i64: 2, 3>, scalar_prefetch = 0 : i64, scratch_operands = 4 : i64, tpu.core_type = #tpu.core_type<tc>, window_params = [{transform_indices = @transform_0, window_bounds = array<i64: 32, 128>}, {transform_indices = @transform_1, window_bounds = array<i64: 32, 128>}, {pipeline_mode = #tpu.pipeline_mode<synchronous>, transform_indices = @transform_2, window_bounds = array<i64: 1, 768>}, {transform_indices = @transform_3, window_bounds = array<i64: 1, 32, 4>}]} {
    %c0_i32 = arith.constant 0 : i32
    %0 = arith.cmpi eq, %arg1, %c0_i32 : i32
    %1 = arith.extui %0 : i1 to i32
    %c0_i32_0 = arith.constant 0 : i32
    %2 = arith.cmpi ne, %1, %c0_i32_0 : i32
    scf.if %2 {
      %cst = arith.constant 0.000000e+00 : f32
      %30 = vector.broadcast %cst : f32 to vector<32x128xf32>
      %c0_22 = arith.constant 0 : index
      %c0_23 = arith.constant 0 : index
      %31 = vector.load %arg6[%c0_22, %c0_23] : memref<32x128xf32, #tpu.memory_space<vmem>>, vector<32x128xf32>
      tpu.vector_store %arg6[%c0_22, %c0_23], %30 {strides = array<i32>} : memref<32x128xf32, #tpu.memory_space<vmem>>, vector<32x128xf32>,
      %cst_24 = arith.constant 0.000000e+00 : f32
      %32 = vector.broadcast %cst_24 : f32 to vector<32x128xf32>
      %c0_25 = arith.constant 0 : index
      %c0_26 = arith.constant 0 : index
      %33 = vector.load %arg7[%c0_25, %c0_26] : memref<32x128xf32, #tpu.memory_space<vmem>>, vector<32x128xf32>
      tpu.vector_store %arg7[%c0_25, %c0_26], %32 {strides = array<i32>} : memref<32x128xf32, #tpu.memory_space<vmem>>, vector<32x128xf32>,
      %cst_27 = arith.constant 0.000000e+00 : f32
      %34 = vector.broadcast %cst_27 : f32 to vector<32x128xf32>
      %c0_28 = arith.constant 0 : index
      %c0_29 = arith.constant 0 : index
      %35 = vector.load %arg8[%c0_28, %c0_29] : memref<32x128xf32, #tpu.memory_space<vmem>>, vector<32x128xf32>
      tpu.vector_store %arg8[%c0_28, %c0_29], %34 {strides = array<i32>} : memref<32x128xf32, #tpu.memory_space<vmem>>, vector<32x128xf32>,
      %cst_30 = arith.constant 0.000000e+00 : f32
      %36 = vector.broadcast %cst_30 : f32 to vector<32x128xf32>
      %c0_31 = arith.constant 0 : index
      %c0_32 = arith.constant 0 : index
      %37 = vector.load %arg9[%c0_31, %c0_32] : memref<32x128xf32, #tpu.memory_space<vmem>>, vector<32x128xf32>
      tpu.vector_store %arg9[%c0_31, %c0_32], %36 {strides = array<i32>} : memref<32x128xf32, #tpu.memory_space<vmem>>, vector<32x128xf32>,
    } else {
    }
    %c3_i32 = arith.constant 3 : i32
    %3 = arith.muli %arg0, %c3_i32 : i32
    %4 = arith.addi %3, %arg1 : i32
    %c128_i32 = arith.constant 128 : i32
    %5 = arith.muli %4, %c128_i32 : i32
    %6 = tpu.assume_multiple %5, 128 : i32
    %c0 = arith.constant 0 : index
    %7 = arith.index_cast %6 : i32 to index
    %8 = vector.load %arg4[%c0, %7] : memref<1x768xf32, #tpu.memory_space<vmem>>, vector<1x128xf32>
    %c0_1 = arith.constant 0 : index
    %c0_2 = arith.constant 0 : index
    %9 = vector.load %arg2[%c0_1, %c0_2] : memref<32x128xf32, #tpu.memory_space<vmem>>, vector<32x128xf32>
    %c0_3 = arith.constant 0 : index
    %c0_4 = arith.constant 0 : index
    %10 = vector.load %arg3[%c0_3, %c0_4] : memref<32x128xf32, #tpu.memory_space<vmem>>, vector<32x128xf32>
    %11 = arith.mulf %9, %9 : vector<32x128xf32>
    %12 = arith.mulf %10, %10 : vector<32x128xf32>
    %13 = vector.broadcast %8 : vector<1x128xf32> to vector<32x128xf32>
    %14 = arith.mulf %9, %13 : vector<32x128xf32>
    %c0_5 = arith.constant 0 : index
    %c0_6 = arith.constant 0 : index
    %15 = vector.load %arg6[%c0_5, %c0_6] : memref<32x128xf32, #tpu.memory_space<vmem>>, vector<32x128xf32>
    %16 = arith.addf %15, %11 : vector<32x128xf32>
    %c0_7 = arith.constant 0 : index
    %c0_8 = arith.constant 0 : index
    %17 = vector.load %arg6[%c0_7, %c0_8] : memref<32x128xf32, #tpu.memory_space<vmem>>, vector<32x128xf32>
    tpu.vector_store %arg6[%c0_7, %c0_8], %16 {strides = array<i32>} : memref<32x128xf32, #tpu.memory_space<vmem>>, vector<32x128xf32>,
    %c0_9 = arith.constant 0 : index
    %c0_10 = arith.constant 0 : index
    %18 = vector.load %arg7[%c0_9, %c0_10] : memref<32x128xf32, #tpu.memory_space<vmem>>, vector<32x128xf32>
    %19 = arith.addf %18, %12 : vector<32x128xf32>
    %c0_11 = arith.constant 0 : index
    %c0_12 = arith.constant 0 : index
    %20 = vector.load %arg7[%c0_11, %c0_12] : memref<32x128xf32, #tpu.memory_space<vmem>>, vector<32x128xf32>
    tpu.vector_store %arg7[%c0_11, %c0_12], %19 {strides = array<i32>} : memref<32x128xf32, #tpu.memory_space<vmem>>, vector<32x128xf32>,
    %c0_13 = arith.constant 0 : index
    %c0_14 = arith.constant 0 : index
    %21 = vector.load %arg8[%c0_13, %c0_14] : memref<32x128xf32, #tpu.memory_space<vmem>>, vector<32x128xf32>
    %22 = arith.addf %21, %14 : vector<32x128xf32>
    %c0_15 = arith.constant 0 : index
    %c0_16 = arith.constant 0 : index
    %23 = vector.load %arg8[%c0_15, %c0_16] : memref<32x128xf32, #tpu.memory_space<vmem>>, vector<32x128xf32>
    tpu.vector_store %arg8[%c0_15, %c0_16], %22 {strides = array<i32>} : memref<32x128xf32, #tpu.memory_space<vmem>>, vector<32x128xf32>,
    %c0_17 = arith.constant 0 : index
    %c0_18 = arith.constant 0 : index
    %24 = vector.load %arg9[%c0_17, %c0_18] : memref<32x128xf32, #tpu.memory_space<vmem>>, vector<32x128xf32>
    %25 = arith.addf %24, %10 : vector<32x128xf32>
    %c0_19 = arith.constant 0 : index
    %c0_20 = arith.constant 0 : index
    %26 = vector.load %arg9[%c0_19, %c0_20] : memref<32x128xf32, #tpu.memory_space<vmem>>, vector<32x128xf32>
    tpu.vector_store %arg9[%c0_19, %c0_20], %25 {strides = array<i32>} : memref<32x128xf32, #tpu.memory_space<vmem>>, vector<32x128xf32>,
    %c2_i32 = arith.constant 2 : i32
    %27 = arith.cmpi eq, %arg1, %c2_i32 : i32
    %28 = arith.extui %27 : i1 to i32
    %c0_i32_21 = arith.constant 0 : i32
    %29 = arith.cmpi ne, %28, %c0_i32_21 : i32
    scf.if %29 {
      %c0_22 = arith.constant 0 : index
      %c0_23 = arith.constant 0 : index
      %30 = vector.load %arg6[%c0_22, %c0_23] : memref<32x128xf32, #tpu.memory_space<vmem>>, vector<32x128xf32>
      %cst = arith.constant dense<0.000000e+00> : vector<32xf32>
      %31 = vector.multi_reduction <add>, %30, %cst [1] : vector<32x128xf32> to vector<32xf32>
      %32 = vector.shape_cast %31 : vector<32xf32> to vector<32x1xf32>
      %c0_24 = arith.constant 0 : index
      %c0_25 = arith.constant 0 : index
      %33 = vector.load %arg7[%c0_24, %c0_25] : memref<32x128xf32, #tpu.memory_space<vmem>>, vector<32x128xf32>
      %cst_26 = arith.constant dense<0.000000e+00> : vector<32xf32>
      %34 = vector.multi_reduction <add>, %33, %cst_26 [1] : vector<32x128xf32> to vector<32xf32>
      %35 = vector.shape_cast %34 : vector<32xf32> to vector<32x1xf32>
      %c0_27 = arith.constant 0 : index
      %c0_28 = arith.constant 0 : index
      %36 = vector.load %arg8[%c0_27, %c0_28] : memref<32x128xf32, #tpu.memory_space<vmem>>, vector<32x128xf32>
      %cst_29 = arith.constant dense<0.000000e+00> : vector<32xf32>
      %37 = vector.multi_reduction <add>, %36, %cst_29 [1] : vector<32x128xf32> to vector<32xf32>
      %38 = vector.shape_cast %37 : vector<32xf32> to vector<32x1xf32>
      %c0_30 = arith.constant 0 : index
      %c0_31 = arith.constant 0 : index
      %39 = vector.load %arg9[%c0_30, %c0_31] : memref<32x128xf32, #tpu.memory_space<vmem>>, vector<32x128xf32>
      %cst_32 = arith.constant dense<0.000000e+00> : vector<32xf32>
      %40 = vector.multi_reduction <add>, %39, %cst_32 [1] : vector<32x128xf32> to vector<32xf32>
      %41 = vector.shape_cast %40 : vector<32xf32> to vector<32x1xf32>
      %42 = tpu.concatenate %32, %35, %38, %41 in 1 : vector<32x1xf32>, vector<32x1xf32>, vector<32x1xf32>, vector<32x1xf32> -> vector<32x4xf32>
      %43 = vector.shape_cast %42 : vector<32x4xf32> to vector<1x32x4xf32>
      %c0_33 = arith.constant 0 : index
      %c0_34 = arith.constant 0 : index
      %c0_35 = arith.constant 0 : index
      %44 = vector.load %arg5[%c0_33, %c0_34, %c0_35] : memref<1x32x4xf32, #tpu.memory_space<vmem>>, vector<1x32x4xf32>
      tpu.vector_store %arg5[%c0_33, %c0_34, %c0_35], %43 {strides = array<i32>} : memref<1x32x4xf32, #tpu.memory_space<vmem>>, vector<1x32x4xf32>,
    } else {
    }
    return
  }
  func.func @transform_0(%arg0: i32, %arg1: i32) -> (i32, i32) {
    %c3_i32 = arith.constant 3 : i32
    %0 = arith.muli %arg0, %c3_i32 : i32
    %1 = arith.addi %0, %arg1 : i32
    %c0_i32 = arith.constant 0 : i32
    %c0_i32_0 = arith.constant 0 : i32
    return %c0_i32, %1 : i32, i32
  }
  func.func @transform_1(%arg0: i32, %arg1: i32) -> (i32, i32) {
    %c3_i32 = arith.constant 3 : i32
    %0 = arith.muli %arg0, %c3_i32 : i32
    %1 = arith.addi %0, %arg1 : i32
    %c0_i32 = arith.constant 0 : i32
    %c0_i32_0 = arith.constant 0 : i32
    return %c0_i32, %1 : i32, i32
  }
  func.func @transform_2(%arg0: i32, %arg1: i32) -> (i32, i32) {
    %c0_i32 = arith.constant 0 : i32
    %c0_i32_0 = arith.constant 0 : i32
    %c0_i32_1 = arith.constant 0 : i32
    return %c0_i32, %c0_i32_0 : i32, i32
  }
  func.func @transform_3(%arg0: i32, %arg1: i32) -> (i32, i32, i32) {
    %c0_i32 = arith.constant 0 : i32
    %c0_i32_0 = arith.constant 0 : i32
    %c0_i32_1 = arith.constant 0 : i32
    return %arg0, %c0_i32, %c0_i32_0 : i32, i32, i32
  }
}

</mosaic_0001>

<bundles_post_ra>
// kernel: tpu_custom_call.1
= control target key start
LH: loop header
LB: loop body
LE: loop exit
PB: predicated region body
PF: predicated region fallthrough
CT: control target
= control target key end

     0   :  { %s1046_s0 = inlined_call_operand.hbm [shape: f32[32,768], index: 0, kind: input, shape index: {}]   ;;  %s1047_s1 = inlined_call_operand.hbm [shape: f32[32,768], index: 1, kind: input, shape index: {}]   ;;  %s1048_s2 = inlined_call_operand.vmem [shape: f32[1,768], index: 2, kind: input, shape index: {}]   ;;  %s1049_s3 = inlined_call_operand.vmem [shape: f32[2,32,4], index: 3, kind: output, shape index: {}]  }
   0x1   :  { %1051 = sst [smem:[#allocation12_spill]] %s1046_s0 }
   0x2   :  { %8 = vsyncpa [#allocation7], 0 }
   0x3   :  { %10 = vsyncpa [#allocation7 + $0x1], 0 }
   0x4   :  { %11 = vsyncpa [#allocation9], 0 }
   0x5   :  { %13 = vsyncpa [#allocation9 + $0x1], 0  ;;  %s794_s12 = smov 0   ;;  %s796_s13 = smov 0  }
   0x6   :  { %s798_s14 = smov 0   ;;  %s800_s15 = smov 0  }
   0x7   :  { %s802_s16 = smov 0   ;;  %s804_s17 = smov 0  }
   0x8   :  { %s806_s18 = smov 0   ;;  %s808_s19 = smov 0  }
   0x9 LB: > { %s536_s20 = sadd.s32 4294967295, %s766_s19   ;;  %s28_s21 = sadd.s32 1, %s758_s17  ;;  %s766_s19 = sphi %s808_s19, %s19_s19   ;;  %s762_s18 = sphi %s806_s18, %s1065_s18   ;;  %s758_s17 = sphi %s804_s17, %s1064_s17   ;;  %s754_s16 = sphi %s802_s16, %s1063_s16   ;;  %s750_s15 = sphi %s800_s15, %s1062_s15   ;;  %s746_s14 = sphi %s798_s14, %s1061_s14   ;;  %s742_s13 = sphi %s796_s13, %s1060_s13   ;;  %s738_s12 = sphi %s794_s12, %s1059_s12  }
   0xa   : > { %p29_p0 = scmp.ge.s32.totalorder %s28_s21, 3  ;;  %s31_s22 = sadd.s32 1, %s762_s18 }
   0xb   : > { %s35_s23 = smul.u32 3, %s762_s18  ;;  %s42_s24 = sadd.s32 1, %s746_s14 }
   0xc   : > { %s1067_s21 = smov (%p29_p0, %s28_s21), 0  ;;  %s1069_s22 = smov (!%p29_p0, %s31_s22), %s762_s18 }
   0xd   : > { %s841_s25 = sadd.s32 %s758_s17, %s35_s23  ;;  %p49_p1 = scmp.ne.s32.totalorder %s746_s14, %s742_s13 }
   0xe   : > { %p33_p2 = scmp.ge.s32.totalorder %s1069_s22, 2  ;;  %p50_p3 = scmp.eq.s32.totalorder %s766_s19, 0 }
   0xf   : > { %p55_p4 = scmp.ne.s32.totalorder %s742_s13, %s738_s12  ;;  %p56_p5 = scmp.eq.s32.totalorder %s536_s20, 0 }
  0x10   : > { %s1071_s22 = smov (%p33_p2, %s1069_s22), 0  ;;  %p849_p6 = por %p50_p3, %p49_p1 }
  0x11   : > { %p853_p7 = por %p56_p5, %p55_p4  ;;  %s37_s28 = smul.u32 3, %s1071_s22 }
  0x12   : > { %p567_p8 = scmp.lt.s32.totalorder %s766_s19, 6  ;;  %s860_s29 = sand.u32 1, %s746_s14  }
  0x13   : > { %s1053_s27 = scalar_select %p853_p7, 1, 0 }
  0x14   : > { %s38_s30 = sadd.s32 %s37_s28, %s1067_s21  ;;  %s540_s5 = sshll.u32 %s860_s29, 5 }
  0x15   : > { %s39_s4 = ssub.s32 %s841_s25, %s38_s30  ;;  %s541_s6 = sshll.u32 %s841_s25, 7 }
  0x16   : > { %p40_p9 = scmp.eq.s32.totalorder %s39_s4, 0  ;;  %s163_s7 = scalar_lea.vmem [#allocation6], %s540_s5 }
  0x17   : > { %s171_s8 = sshll.u32 %s163_s7, 4  ;;  %s1054_s0 = sld [smem:[#allocation12_spill]]  ;;  %s878_s8 = int_to_ptr.vmem [resolvable:$true] %s171_s8 }
  0x18   : > { %s869_s9 = scalar_select %p40_p9, %s746_s14, %s42_s24  }
  0x19   : > { %p882_p10 = pnand %p567_p8, %p849_p6  ;;  %s160_s23 = scalar_lea.sflag [#allocation7], %s860_s29 }
  0x1b   : > { %p638_p13 = pneg %p882_p10 }
  0x1d   : > { %s876_s12 = scalar_lea.hbm %s1054_s0, %s541_s6  ;;  %s641_s26 = scalar_lea.hbm %s1054_s0, 3072 }
  0x1e   : > { %s636_s24 = scalar_lea.hbm %s876_s12, 512  ;;  %p642_p2 = scmp.lt.u32.totalorder %s876_s12, %s1054_s0 }
  0x1f   : > { %p637_p12 = scmp.ne.s32.totalorder %s876_s12, %s636_s24  ;;  %p643_p3 = scmp.lt.u32.totalorder %s641_s26, %s636_s24 }
  0x20   : > { %p645_p5 = scmp.lt.u32.totalorder %s636_s24, %s876_s12 }
  0x21   : > { %p639_p0 = pnand %p638_p13, %p637_p12  ;;  %p644_p4 = por %p643_p3, %p642_p2 }
  0x23   : > { %p640_p1 = pneg %p639_p0  ;;  %p646_p6 = por %p645_p5, %p644_p4 }
  0x25   : > { %p647_p8 = pnand %p646_p6, %p640_p1 }
  0x27   : > { %650 = shalt.err (!%p647_p8)
}
  0x28   : > { %s651_s10 = scalar_lea.vmem %s878_s8, 512  ;;  %s768_s11 = smov [#allocation6]  }
  0x29   : > { %p652_p9 = scmp.ne.s32.totalorder %s878_s8, %s651_s10  ;;  %s656_s28 = sshll.u32 %s768_s11, 4  ;;  %s657_s28 = int_to_ptr.vmem [resolvable:$false] %s656_s28 }
  0x2a   : > { %s658_s30 = scalar_lea.vmem %s657_s28, 1024  ;;  %p659_p11 = scmp.lt.s32.totalorder %s878_s8, %s657_s28 }
  0x2b   : > { %p654_p12 = pnand %p652_p9, %p638_p13  ;;  %p660_p2 = scmp.lt.s32.totalorder %s658_s30, %s651_s10 }
  0x2d   : > { %p655_p0 = pneg %p654_p12  ;;  %p661_p3 = por %p660_p2, %p659_p11 }
  0x2f   : > { %p662_p4 = pnand %p661_p3, %p655_p0 }
  0x31   : > { %665 = shalt.err (!%p662_p4)
}
  0x32   : > { %s769_s24 = smov 768   ;;  %s770_s26 = smov 128  }
  0x33   : > { %s771_s4 = smov 8   ;;  %p201_p11 = scmp.lt.s32.totalorder %s766_s19, 7 }
  0x34   : > { %563 = dma.hbm_to_vmem [thread:$0]  (!%p882_p10), %s876_s12, 512, %s878_s8, %s160_s23, %s769_s24, %s770_s26, %s771_s4  }
  0x35   : > { %s924_s11 = scalar_lea.hbm %s1047_s1, %s541_s6  ;;  %p1056_p1 = scmp.ge.s32.totalorder %s766_s19, 1 }
  0x36   : > { %s185_s30 = scalar_lea.vmem [#allocation8], %s540_s5  ;;  %s182_s25 = scalar_lea.sflag [#allocation9], %s860_s29 }
  0x37   : > { %p928_p5 = pnand %p1056_p1, %p201_p11  ;;  %s193_s0 = sshll.u32 %s185_s30, 4  ;;  %s934_s0 = int_to_ptr.vmem [resolvable:$true] %s193_s0 }
  0x38   : > { %s666_s8 = scalar_lea.hbm %s924_s11, 512  ;;  %s671_s23 = scalar_lea.hbm %s1047_s1, 3072 }
  0x39   : > { %p667_p6 = scmp.ne.s32.totalorder %s924_s11, %s666_s8  ;;  %p672_p12 = scmp.lt.u32.totalorder %s924_s11, %s1047_s1 }
  0x3a   : > { %p673_p0 = scmp.lt.u32.totalorder %s671_s23, %s666_s8  ;;  %p675_p3 = scmp.lt.u32.totalorder %s666_s8, %s924_s11 }
  0x3b   : > { %p669_p8 = pnand %p667_p6, %p638_p13 }
  0x3c   : > { %p674_p2 = por %p673_p0, %p672_p12 }
  0x3d   : > { %p670_p9 = pneg %p669_p8 }
  0x3e   : > { %p676_p4 = por %p675_p3, %p674_p2 }
  0x40   : > { %p677_p11 = pnand %p676_p4, %p670_p9 }
  0x42   : > { %680 = shalt.err (!%p677_p11)
}
  0x43   : > { %s681_s5 = scalar_lea.vmem %s934_s0, 512  ;;  %s772_s30 = smov [#allocation8]  }
  0x44   : > { %p682_p1 = scmp.ne.s32.totalorder %s934_s0, %s681_s5  ;;  %s686_s6 = sshll.u32 %s772_s30, 4  ;;  %s687_s6 = int_to_ptr.vmem [resolvable:$false] %s686_s6 }
  0x45   : > { %s688_s12 = scalar_lea.vmem %s687_s6, 1024  ;;  %p689_p7 = scmp.lt.s32.totalorder %s934_s0, %s687_s6 }
  0x46   : > { %p684_p6 = pnand %p682_p1, %p638_p13  ;;  %p690_p12 = scmp.lt.s32.totalorder %s688_s12, %s681_s5 }
  0x48   : > { %p685_p8 = pneg %p684_p6  ;;  %p691_p0 = por %p690_p12, %p689_p7 }
  0x4a   : > { %p692_p2 = pnand %p691_p0, %p685_p8 }
  0x4c   : > { %695 = shalt.err (!%p692_p2)
}
  0x4d   : > { %566 = dma.hbm_to_vmem [thread:$0]  (!%p882_p10), %s924_s11, 512, %s934_s0, %s182_s25, %s769_s24, %s770_s26, %s771_s4  }
  0x4e   : > { %205 = sbr.rel (%p928_p5) target bundleno = 285 (0x11d), region = 32  ;;  %s207_s8 = sand.u32 (!%p928_p5), 1, %s742_s13  }
  0x4f   : > { %s545_s23 = sshll.u32 (!%p928_p5), %s207_s8, 5  ;;  %s208_s7 = scalar_lea.sflag (!%p928_p5), [#allocation7], %s207_s8 }
  0x50   : > { %s968_s10 = scalar_lea.vmem (!%p928_p5), [#allocation6], %s545_s23  ;;  %p1058_p7 = scmp.ne.s32.totalorder (!%p928_p5), %s1053_s27, 0 }
  0x55   : > { %729 = dma.done.wait (%p1058_p7), %s208_s7, 512  }
  0x56   : > { %731 = vsyncadd (%p1058_p7), %s208_s7, 4294966784  ;;  %s217_s29 = scalar_lea.sflag [#allocation9], %s207_s8  ;;  %s974_s20 = scalar_lea.vmem [#allocation8], %s545_s23 }
  0x57   : > { %733 = dma.done.wait (%p1058_p7), %s217_s29, 512  }
  0x58   : > { %735 = vsyncadd (%p1058_p7), %s217_s29, 4294966784  ;;  %p252_p10 = scmp.lt.s32.totalorder %s754_s16, 1  ;;  %p549_p13 = scmp.ne.s32.totalorder %s750_s15, 0 }
  0x59   : > { %v773_v0 = vmov (!%p549_p13), 0.0  }
  0x5a   : > { %s253_s0 = scalar_select %p252_p10, %s754_s16, 1 }
  0x5b   : > { %260 = sbr.rel (%p549_p13) target bundleno = 99 (0x63), region = 44  ;;  %261 = vst [vmem:[#allocation2] sm:$0xff] (!%p549_p13), %v773_v0  ;;  %262 = vst [vmem:[#allocation2 + $0x8] sm:$0xff] (!%p549_p13), %v773_v0 }
  0x5c   : > { %s555_s24 = sshll.u32 %s253_s0, 5  ;;  %263 = vst [vmem:[#allocation2 + $0x10] sm:$0xff] (!%p549_p13), %v773_v0  ;;  %264 = vst [vmem:[#allocation2 + $0x18] sm:$0xff] (!%p549_p13), %v773_v0 }
  0x5d   : > { %s985_s11 = scalar_lea.vmem %s1049_s3, %s555_s24  ;;  %265 = vst [vmem:[#allocation3] sm:$0xff] (!%p549_p13), %v773_v0  ;;  %266 = vst [vmem:[#allocation3 + $0x8] sm:$0xff] (!%p549_p13), %v773_v0 }
  0x5e   : > { %267 = vst [vmem:[#allocation3 + $0x10] sm:$0xff] (!%p549_p13), %v773_v0  ;;  %268 = vst [vmem:[#allocation3 + $0x18] sm:$0xff] (!%p549_p13), %v773_v0 }
  0x5f   : > { %269 = vst [vmem:[#allocation4] sm:$0xff] (!%p549_p13), %v773_v0  ;;  %270 = vst [vmem:[#allocation4 + $0x8] sm:$0xff] (!%p549_p13), %v773_v0 }
  0x60   : > { %271 = vst [vmem:[#allocation4 + $0x10] sm:$0xff] (!%p549_p13), %v773_v0  ;;  %272 = vst [vmem:[#allocation4 + $0x18] sm:$0xff] (!%p549_p13), %v773_v0 }
  0x61   : > { %273 = vst [vmem:[#allocation5] sm:$0xff] (!%p549_p13), %v773_v0  ;;  %274 = vst [vmem:[#allocation5 + $0x8] sm:$0xff] (!%p549_p13), %v773_v0 }
  0x62   : > { %275 = vst [vmem:[#allocation5 + $0x10] sm:$0xff] %v773_v0  ;;  %276 = vst [vmem:[#allocation5 + $0x18] sm:$0xff] %v773_v0 }
  0x63 PF: > { %v284_v1 = vld [vmem:[%s968_s10] sm:$0xff]  ;;  %v285_v3 = vld [vmem:[%s968_s10 + $0x8] sm:$0xff]  ;;  %s277_s27 = smul.u32 3, %s754_s16  ;;  %v286_v7 = vld [vmem:[%s968_s10 + $0x10] sm:$0xff]  ;;  %p552_p5 = scmp.ne.s32.totalorder %s750_s15, 2 }
  0x64   : > { %v310_v2 = vld [vmem:[#allocation2] sm:$0xff]  ;;  %v292_v4 = vmul.f32 %v284_v1, %v284_v1  ;;  %v293_v5 = vmul.f32 %v285_v3, %v285_v3  ;;  %v311_v6 = vld [vmem:[#allocation2 + $0x8] sm:$0xff]  ;;  %v312_v8 = vld [vmem:[#allocation2 + $0x10] sm:$0xff]  ;;  %v294_v9 = vmul.f32 %v286_v7, %v286_v7  ;;  %vm410_vm0 = vcmask (!%p552_p5), 7168  }
  0x65   : > { %v287_v10 = vld [vmem:[%s968_s10 + $0x18] sm:$0xff]  ;;  %v288_v12 = vld [vmem:[%s974_s20] sm:$0xff]  ;;  %s278_s28 = sadd.s32 %s750_s15, %s277_s27  ;;  %v289_v18 = vld [vmem:[%s974_s20 + $0x8] sm:$0xff]  ;;  %vm415_vm1 = vcmask (!%p552_p5), 15360   ;;  %vm420_vm2 = vcmask (!%p552_p5), 23552   ;;  %vm425_vm3 = vcmask (!%p552_p5), 31744  }
  0x66   : > { %v313_v11 = vld [vmem:[#allocation2 + $0x18] sm:$0xff]  ;;  %v314_v13 = vadd.f32 %v310_v2, %v292_v4  ;;  %v315_v14 = vadd.f32 %v311_v6, %v293_v5  ;;  %v295_v15 = vmul.f32 %v287_v10, %v287_v10  ;;  %v296_v16 = vmul.f32 %v288_v12, %v288_v12  ;;  %v322_v17 = vld [vmem:[#allocation3] sm:$0xff]  ;;  %v323_v19 = vld [vmem:[#allocation3 + $0x8] sm:$0xff]  ;;  %s550_s16 = sshll.u32 %s278_s28, 7 }
  0x67   : > { %v316_v20 = vadd.f32 %v312_v8, %v294_v9  ;;  %v297_v21 = vmul.f32 %v289_v18, %v289_v18  ;;  %v290_v22 = vld [vmem:[%s974_s20 + $0x10] sm:$0xff]  ;;  %v291_v24 = vld [vmem:[%s974_s20 + $0x18] sm:$0xff]  ;;  %s280_s25 = sshra.s32 %s550_s16, 7  ;;  %v334_v30 = vld [vmem:[#allocation4] sm:$0xff] }
  0x68   : > { %v324_v23 = vld [vmem:[#allocation3 + $0x10] sm:$0xff]  ;;  %318 = vst [vmem:[#allocation2] sm:$0xff] %v314_v13  ;;  %319 = vst [vmem:[#allocation2 + $0x8] sm:$0xff] %v315_v14  ;;  %v317_v25 = vadd.f32 %v313_v11, %v295_v15  ;;  %v326_v26 = vadd.f32 %v322_v17, %v296_v16  ;;  %v298_v27 = vmul.f32 %v290_v22, %v290_v22  ;;  %v325_v29 = vld [vmem:[#allocation3 + $0x18] sm:$0xff]  ;;  %s282_s6 = scalar_lea.vmem %s1048_s2, %s280_s25 }
  0x69   : > { %v299_v28 = vmul.f32 %v291_v24, %v291_v24  ;;  %v335_v31 = vld [vmem:[#allocation4 + $0x8] sm:$0xff]  ;;  %320 = vst [vmem:[#allocation2 + $0x10] sm:$0xff] %v316_v20  ;;  %v327_v32 = vadd.f32 %v323_v19, %v297_v21  ;;  %v551_v33 = vld [vmem:[%s282_s6] ss:$0 sm:$0xff]  ;;  %v336_v34 = vld [vmem:[#allocation4 + $0x10] sm:$0xff] }
  0x6a   : > { %v337_v35 = vld [vmem:[#allocation4 + $0x18] sm:$0xff]  ;;  %321 = vst [vmem:[#allocation2 + $0x18] sm:$0xff] %v317_v25  ;;  %330 = vst [vmem:[#allocation3] sm:$0xff] %v326_v26  ;;  %v328_v36 = vadd.f32 %v324_v23, %v298_v27  ;;  %v306_v38 = vmul.f32 %v551_v33, %v284_v1  ;;  %v307_v39 = vmul.f32 %v551_v33, %v285_v3  ;;  %v346_v40 = vld [vmem:[#allocation5] sm:$0xff] }
  0x6b   : > { %v329_v37 = vadd.f32 %v325_v29, %v299_v28  ;;  %v347_v41 = vld [vmem:[#allocation5 + $0x8] sm:$0xff]  ;;  %v348_v42 = vld [vmem:[#allocation5 + $0x10] sm:$0xff]  ;;  %331 = vst [vmem:[#allocation3 + $0x8] sm:$0xff] %v327_v32  ;;  %v308_v43 = vmul.f32 %v551_v33, %v286_v7  ;;  %v309_v44 = vmul.f32 %v551_v33, %v287_v10  ;;  %v350_v45 = vadd.f32 %v346_v40, %v288_v12  ;;  %v349_v47 = vld [vmem:[#allocation5 + $0x18] sm:$0xff]  ;;  %361 = sbr.rel (%p552_p5) target bundleno = 285 (0x11d), region = 48 }
  0x6c   : > { %v351_v46 = vadd.f32 %v347_v41, %v289_v18  ;;  %332 = vst [vmem:[#allocation3 + $0x10] sm:$0xff] %v328_v36  ;;  %v338_v48 = vadd.f32 %v334_v30, %v306_v38  ;;  %v339_v49 = vadd.f32 %v335_v31, %v307_v39  ;;  %v352_v50 = vadd.f32 %v348_v42, %v290_v22 }
  0x6d   : > { %333 = vst [vmem:[#allocation3 + $0x18] sm:$0xff] %v329_v37  ;;  %v353_v51 = vadd.f32 %v349_v47, %v291_v24  ;;  %v340_v52 = vadd.f32 %v336_v34, %v308_v43  ;;  %v341_v53 = vadd.f32 %v337_v35, %v309_v44  ;;  %354 = vst [vmem:[#allocation5] sm:$0xff] %v350_v45 }
  0x6e   : > { %355 = vst [vmem:[#allocation5 + $0x8] sm:$0xff] %v351_v46  ;;  %342 = vst [vmem:[#allocation4] sm:$0xff] %v338_v48 }
  0x6f   : > { %343 = vst [vmem:[#allocation4 + $0x8] sm:$0xff] %v339_v49  ;;  %356 = vst [vmem:[#allocation5 + $0x10] sm:$0xff] %v352_v50  ;;  %v362_v55 = vld [vmem:[#allocation2] sm:$0xff] (!%p552_p5)  ;;  %v363_v57 = vld [vmem:[#allocation2 + $0x8] sm:$0xff] (!%p552_p5) }
  0x70   : > { %357 = vst [vmem:[#allocation5 + $0x18] sm:$0xff] %v353_v51  ;;  %344 = vst [vmem:[#allocation4 + $0x10] sm:$0xff] %v340_v52  ;;  %v364_v54 = vld [vmem:[#allocation2 + $0x10] sm:$0xff] (!%p552_p5)  ;;  %366 = vadd.xlane.f32.xlu0 (!%p552_p5), %v362_v55 }
  0x71   : > { %345 = vst [vmem:[#allocation4 + $0x18] sm:$0xff] %v341_v53  ;;  %370 = vadd.xlane.f32.xlu1 (!%p552_p5), %v364_v54  ;;  %v365_v56 = vld [vmem:[#allocation2 + $0x18] sm:$0xff] (!%p552_p5)  ;;  %v374_v59 = vld [vmem:[#allocation3] sm:$0xff] (!%p552_p5) }
  0x72   : > { %v375_v58 = vld [vmem:[#allocation3 + $0x8] sm:$0xff] }
  0x73   : > { %v376_v61 = vld [vmem:[#allocation3 + $0x10] sm:$0xff] }
  0x74   : > { %368 = vadd.xlane.f32.xlu0 %v363_v57  ;;  %v377_v60 = vld [vmem:[#allocation3 + $0x18] sm:$0xff]  ;;  %v398_v3 = vld [vmem:[#allocation5] sm:$0xff] }
  0x75   : > { %372 = vadd.xlane.f32.xlu1 %v365_v56  ;;  %v386_v63 = vld [vmem:[#allocation4] sm:$0xff]  ;;  %v399_v2 = vld [vmem:[#allocation5 + $0x8] sm:$0xff] }
  0x76   : > { %v387_v62 = vld [vmem:[#allocation4 + $0x8] sm:$0xff]  ;;  %v400_v5 = vld [vmem:[#allocation5 + $0x10] sm:$0xff] }
  0x77   : > { %v388_v1 = vld [vmem:[#allocation4 + $0x10] sm:$0xff]  ;;  %v401_v4 = vld [vmem:[#allocation5 + $0x18] sm:$0xff] }
  0x78   : > { %378 = vadd.xlane.f32.xlu0 %v374_v59  ;;  %v389_v0 = vld [vmem:[#allocation4 + $0x18] sm:$0xff] }
  0x79   : > { %380 = vadd.xlane.f32.xlu1 %v375_v58 }
  0x7c   : > { %382 = vadd.xlane.f32.xlu0 %v376_v61 }
  0x7d   : > { %384 = vadd.xlane.f32.xlu1 %v377_v60 }
  0x80   : > { %390 = vadd.xlane.f32.xlu0 %v386_v63 }
  0x81   : > { %392 = vadd.xlane.f32.xlu1 %v387_v62 }
  0x84   : > { %394 = vadd.xlane.f32.xlu0 %v388_v1 }
  0x85   : > { %396 = vadd.xlane.f32.xlu1 %v389_v0 }
  0x88   : > { %402 = vadd.xlane.f32.xlu0 %v398_v3 }
  0x89   : > { %404 = vadd.xlane.f32.xlu1 %v399_v2 }
  0x8c   : > { %406 = vadd.xlane.f32.xlu0 %v400_v5 }
  0x8d   : > { %408 = vadd.xlane.f32.xlu1 %v401_v4 }
  0xfd   : > { %v367_v7 = vpop.xlane.xlu0 %366 }
  0xfe   : > { %v371_v6 = vpop.xlane.xlu1 %370 }
 0x101   : > { %v369_v9 = vpop.xlane.xlu0 %368 }
 0x102   : > { %v373_v8 = vpop.xlane.xlu1 %372 }
 0x105   : > { %v379_v11 = vpop.xlane.xlu0 %378 }
 0x106   : > { %v381_v10 = vpop.xlane.xlu1 %380  ;;  %v411_v19 = vsel %vm410_vm0, %v367_v7, %v379_v11 }
 0x107   : > { %v412_v18 = vsel %vm410_vm0, %v369_v9, %v381_v10 }
 0x109   : > { %v383_v13 = vpop.xlane.xlu0 %382 }
 0x10a   : > { %v385_v12 = vpop.xlane.xlu1 %384  ;;  %v413_v27 = vsel %vm410_vm0, %v371_v6, %v383_v13 }
 0x10b   : > { %v414_v26 = vsel %vm410_vm0, %v373_v8, %v385_v12 }
 0x10d   : > { %v391_v15 = vpop.xlane.xlu0 %390 }
 0x10e   : > { %v393_v14 = vpop.xlane.xlu1 %392  ;;  %v416_v21 = vsel %vm415_vm1, %v411_v19, %v391_v15 }
 0x10f   : > { %v417_v20 = vsel %vm415_vm1, %v412_v18, %v393_v14 }
 0x111   : > { %v395_v17 = vpop.xlane.xlu0 %394 }
 0x112   : > { %v397_v16 = vpop.xlane.xlu1 %396  ;;  %v418_v29 = vsel %vm415_vm1, %v413_v27, %v395_v17 }
 0x113   : > { %v419_v28 = vsel %vm415_vm1, %v414_v26, %v397_v16 }
 0x115   : > { %v403_v23 = vpop.xlane.xlu0 %402 }
 0x116   : > { %v405_v22 = vpop.xlane.xlu1 %404  ;;  %v421_v25 = vsel %vm420_vm2, %v416_v21, %v403_v23 }
 0x117   : > { %v422_v24 = vsel %vm420_vm2, %v417_v20, %v405_v22  ;;  %426 = vst.msk [vmem:[%s985_s11] sm:$0xff] %vm425_vm3, %v421_v25 }
 0x118   : > { %427 = vst.msk [vmem:[%s985_s11 + $0x8] sm:$0xff] %vm425_vm3, %v422_v24 }
 0x119   : > { %v407_v31 = vpop.xlane.xlu0 %406 }
 0x11a   : > { %v409_v30 = vpop.xlane.xlu1 %408  ;;  %v423_v33 = vsel %vm420_vm2, %v418_v29, %v407_v31 }
 0x11b   : > { %v424_v32 = vsel %vm420_vm2, %v419_v28, %v409_v30  ;;  %428 = vst.msk [vmem:[%s985_s11 + $0x10] sm:$0xff] %vm425_vm3, %v423_v33 }
 0x11c   : > { %429 = vst.msk [vmem:[%s985_s11 + $0x18] sm:$0xff] %vm425_vm3, %v424_v32 }
 0x11d PF: > { %s19_s19 = sadd.s32 1, %s766_s19   ;;  %s1059_s12 = smov %s742_s13 }
 0x11e   : > { %p16_p9 = scmp.ge.s32.totalorder %s19_s19, 8   ;;  %s1060_s13 = smov %s746_s14 }
 0x11f   : > { %s1061_s14 = smov %s869_s9  ;;  %s1062_s15 = smov %s758_s17 }
 0x120   : > { %s1063_s16 = smov %s762_s18  ;;  %s1064_s17 = smov %s1067_s21 }
 0x121   : > { %s1065_s18 = smov %s1071_s22  ;;  %18 = sbr.rel (!%p16_p9) target bundleno = 9 (0x9), region = 94 }
 0x128   :  { %451 = vsyncpa [#allocation7], 1 }
 0x129   :  { %453 = vsyncpa [#allocation7 + $0x1], 1 }
 0x12a   :  { %454 = vsyncpa [#allocation9], 1 }
 0x12b   :  { %456 = vsyncpa [#allocation9 + $0x1], 1 }

</bundles_post_ra>
